<compile_context>
chip_gen: v6e
topology: v6e:2x2x1
jax: 0.10.0
libtpu: 0.0.40
codegen_flags: <defaults>
</compile_context>

<pallas_src>
import functools

import jax
import jax.numpy as jnp
from jax.experimental import pallas as pl
from jax.experimental.pallas import tpu as pltpu

LANES = 128
SUBLANES = 8
ACC_ROWS = 64               # (64, 128) f32 partial-sum accumulator = 8 vregs
DEFAULT_BLOCK_ROWS = 4096   # (4096, 128) f32 block = 2 MiB per input


def _round_up(x, m):
    return ((x + m - 1) // m) * m


def _num_tensorcores():
    """Best-effort TensorCore-per-chip count; falls back to 1 (always safe)."""
    try:
        info = pltpu.get_tpu_info()
    except Exception:
        return 1
    for attr in ("num_cores", "core_count", "num_tensorcores",
                 "tensorcore_count", "cores_per_chip", "num_cores_per_chip"):
        v = getattr(info, attr, None)
        if isinstance(v, int) and v > 0:
            return min(int(v), 2)   # only v7x (2 TCs) benefits from P>1
    return 1


def _smape_kernel(im_ref, ref_ref, out_ref, acc_ref, *,
                  eps, rows_total, block_rows, acc_rows, approx):
    p = pl.program_id(0)          # parallel chunk (megacore on v7x)
    k = pl.program_id(1)          # sequential blocks within the chunk
    nk = pl.num_programs(1)

    @pl.when(k == 0)
    def _():
        acc_ref[...] = jnp.zeros_like(acc_ref)

    row0 = (p * nk + k) * block_rows
    n_sub = block_rows // acc_rows

    def _term():
        im = im_ref[...].astype(jnp.float32)
        rf = ref_ref[...].astype(jnp.float32)
        num = jnp.abs(im - rf)
        den = eps + jnp.abs(im) + jnp.abs(rf)
        if approx:
            # EUP reciprocal; frees VPU refinement ops of the exact divide.
            return num * pl.reciprocal(den, approx=True)
        return num / den

    def _accumulate(term):
        # Fold the (block_rows, 128) tile into the small partial-sum buffer.
        acc_ref[...] += term.reshape(n_sub, acc_rows, LANES).sum(axis=0)

    # Fast path: block lies entirely inside the array -> no iota/mask/select.
    @pl.when(row0 + block_rows <= rows_total)
    def _():
        _accumulate(_term())

    # Cold path: partial last block or clamped out-of-range block. Single
    # select on the final term (where() discards any garbage/NaN in the pad).
    @pl.when(row0 + block_rows > rows_total)
    def _():
        row_ids = row0 + jax.lax.broadcasted_iota(
            jnp.int32, (block_rows, LANES), 0)
        _accumulate(jnp.where(row_ids < rows_total, _term(), 0.0))

    @pl.when(k == nk - 1)
    def _():
        # One small cross-sublane (XLU) reduce per parallel chunk.
        out_ref[...] = jnp.sum(acc_ref[...], axis=0, keepdims=True)


def smape_loss(im, ref, eps=0.01, block_rows=DEFAULT_BLOCK_ROWS,
               num_parallel=None, approx=True):
    assert im.shape == ref.shape
    n = im.size

    # Flatten in native dtype (cast happens in-kernel).
    im_f = jnp.ravel(im)
    ref_f = jnp.ravel(ref)

    # Only a tiny lane-alignment pad (<=127 elems) when n % 128 != 0; the
    # padded zeros contribute 0 (denominator is eps > 0).
    pad = (-n) % LANES
    if pad:
        im_f = jnp.pad(im_f, (0, pad))
        ref_f = jnp.pad(ref_f, (0, pad))
    rows = (n + pad) // LANES
    im2 = im_f.reshape(rows, LANES)
    ref2 = ref_f.reshape(rows, LANES)

    # Clamp the block so tiny inputs don't pay for a full-height block.
    br = min(block_rows, _round_up(rows, SUBLANES))
    # Small partial-sum accumulator when the block divides evenly; otherwise
    # (tiny / irregular blocks) accumulate at full block height.
    acc_rows = ACC_ROWS if (br >= ACC_ROWS and br % ACC_ROWS == 0) else br

    n_blocks = pl.cdiv(rows, br)
    if num_parallel is None:
        num_parallel = _num_tensorcores()
    P = max(1, min(num_parallel, n_blocks))   # parallel chunks
    K = pl.cdiv(n_blocks, P)                  # sequential blocks per chunk

    def in_map(p, k):
        # Clamp so an out-of-range trailing block (when P*K > n_blocks) reads a
        # valid block; the in-kernel mask zeroes its contribution.
        return (jnp.minimum(p * K + k, n_blocks - 1), 0)

    kernel = functools.partial(
        _smape_kernel, eps=float(eps), rows_total=rows, block_rows=br,
        acc_rows=acc_rows, approx=approx)

    partial = pl.pallas_call(
        kernel,
        out_shape=jax.ShapeDtypeStruct((P, LANES), jnp.float32),
        grid_spec=pltpu.PrefetchScalarGridSpec(
            num_scalar_prefetch=0,
            grid=(P, K),
            in_specs=[
                pl.BlockSpec((br, LANES), in_map),
                pl.BlockSpec((br, LANES), in_map),
            ],
            out_specs=pl.BlockSpec((1, LANES), lambda p, k: (p, 0)),
            scratch_shapes=[pltpu.VMEM((acc_rows, LANES), jnp.float32)],
        ),
        compiler_params=pltpu.CompilerParams(
            dimension_semantics=("parallel", "arbitrary"),
            # Explicit limit: 2 inputs x 2 buffers x 2 MiB + scratch fits on
            # v5e (16 MiB default would be tight) and is well under v7x's
            # 64 MiB physical per TC.
            vmem_limit_bytes=32 * 1024 * 1024,
        ),
    )(im2, ref2)

    # Tiny (P, 128) cross-lane reduce + mean in plain JAX.
    return jnp.sum(partial) / jnp.float32(n)


def smape_ref(im, ref, eps=0.01):
    im = im.astype(jnp.float32)
    ref = ref.astype(jnp.float32)
    return jnp.mean(jnp.abs(im - ref) / (eps + jnp.abs(im) + jnp.abs(ref)))


if __name__ == "__main__":
    key = jax.random.PRNGKey(0)
    k1, k2, k3, k4, k5, k6 = jax.random.split(key, 6)

    # approx reciprocal -> ~1e-4 relative error per term; loosen tolerance.
    RTOL, ATOL = 1e-3, 1e-6

    # Primary case: NCHW image pair, as the PyTorch module would receive.
    im = jax.random.normal(k1, (2, 4, 16, 16), dtype=jnp.float32)
    ref = jax.random.normal(k2, (2, 4, 16, 16), dtype=jnp.float32)
    loss = jax.block_until_ready(smape_loss(im, ref, eps=0.01))
    expected = smape_ref(im, ref, eps=0.01)
    assert jnp.allclose(loss, expected, rtol=RTOL, atol=ATOL), (loss, expected)

    # Secondary case: odd row count + small block -> exercises the cold masked
    # path, multi-block accumulation and block-index clamping.
    im_b = jax.random.normal(k3, (2, 4, 33, 16), dtype=jnp.float32)
    ref_b = jax.random.normal(k4, (2, 4, 33, 16), dtype=jnp.float32)
    loss_b = jax.block_until_ready(smape_loss(im_b, ref_b, eps=0.01, block_rows=16))
    expected_b = smape_ref(im_b, ref_b, eps=0.01)
    assert jnp.allclose(loss_b, expected_b, rtol=RTOL, atol=ATOL), (loss_b, expected_b)

    # Third case: explicit 2-way parallel split (both fast + masked blocks).
    im_c = jax.random.normal(k5, (2, 4, 48, 32), dtype=jnp.float32)
    ref_c = jax.random.normal(k6, (2, 4, 48, 32), dtype=jnp.float32)
    loss_c = jax.block_until_ready(
        smape_loss(im_c, ref_c, eps=0.01, block_rows=64, num_parallel=2))
    expected_c = smape_ref(im_c, ref_c, eps=0.01)
    assert jnp.allclose(loss_c, expected_c, rtol=RTOL, atol=ATOL), (loss_c, expected_c)

    print("KERNEL_OK")
</pallas_src>

<mosaic_0001>
module attributes {stable_mosaic.version = 11 : i64} {
  func.func @_smape_kernel(%arg0: i32, %arg1: i32, %arg2: memref<16x128xf32, #tpu.memory_space<vmem>>, %arg3: memref<16x128xf32, #tpu.memory_space<vmem>>, %arg4: memref<1x128xf32, #tpu.memory_space<vmem>>, %arg5: memref<16x128xf32, #tpu.memory_space<vmem>>) attributes {dimension_semantics = [#tpu.dimension_semantics<parallel>, #tpu.dimension_semantics<arbitrary>], iteration_bounds = array<i64: 1, 1>, scalar_prefetch = 0 : i64, scratch_operands = 1 : i64, tpu.core_type = #tpu.core_type<tc>, window_params = [{transform_indices = @transform_0, window_bounds = array<i64: 16, 128>}, {transform_indices = @transform_1, window_bounds = array<i64: 16, 128>}, {transform_indices = @transform_2, window_bounds = array<i64: 1, 128>}]} {
    %c0_i32 = arith.constant 0 : i32
    %0 = arith.cmpi eq, %arg1, %c0_i32 : i32
    %1 = arith.extui %0 : i1 to i32
    %c0_i32_0 = arith.constant 0 : i32
    %2 = arith.cmpi ne, %1, %c0_i32_0 : i32
    scf.if %2 {
      %cst = arith.constant 0.000000e+00 : f32
      %17 = vector.broadcast %cst : f32 to vector<16x128xf32>
      %c0 = arith.constant 0 : index
      %c0_9 = arith.constant 0 : index
      %18 = vector.load %arg5[%c0, %c0_9] : memref<16x128xf32, #tpu.memory_space<vmem>>, vector<16x128xf32>
      tpu.vector_store %arg5[%c0, %c0_9], %17 {strides = array<i32>} : memref<16x128xf32, #tpu.memory_space<vmem>>, vector<16x128xf32>,
    } else {
    }
    %c1_i32 = arith.constant 1 : i32
    %3 = arith.muli %arg0, %c1_i32 : i32
    %4 = arith.addi %3, %arg1 : i32
    %c16_i32 = arith.constant 16 : i32
    %5 = arith.muli %4, %c16_i32 : i32
    %c16_i32_1 = arith.constant 16 : i32
    %6 = arith.addi %5, %c16_i32_1 : i32
    %c16_i32_2 = arith.constant 16 : i32
    %7 = arith.cmpi sle, %6, %c16_i32_2 : i32
    %8 = arith.extui %7 : i1 to i32
    %c0_i32_3 = arith.constant 0 : i32
    %9 = arith.cmpi ne, %8, %c0_i32_3 : i32
    scf.if %9 {
      %c0 = arith.constant 0 : index
      %c0_9 = arith.constant 0 : index
      %17 = vector.load %arg2[%c0, %c0_9] : memref<16x128xf32, #tpu.memory_space<vmem>>, vector<16x128xf32>
      %c0_10 = arith.constant 0 : index
      %c0_11 = arith.constant 0 : index
      %18 = vector.load %arg3[%c0_10, %c0_11] : memref<16x128xf32, #tpu.memory_space<vmem>>, vector<16x128xf32>
      %19 = arith.subf %17, %18 : vector<16x128xf32>
      %20 = math.absf %19 : vector<16x128xf32>
      %21 = math.absf %17 : vector<16x128xf32>
      %cst = arith.constant 0.00999999977 : f32
      %22 = vector.broadcast %cst : f32 to vector<16x128xf32>
      %23 = arith.addf %22, %21 : vector<16x128xf32>
      %24 = math.absf %18 : vector<16x128xf32>
      %25 = arith.addf %23, %24 : vector<16x128xf32>
      %26 = tpu.reciprocal %25 {approx = true} : vector<16x128xf32> -> vector<16x128xf32>
      %27 = arith.mulf %20, %26 : vector<16x128xf32>
      %c0_12 = arith.constant 0 : index
      %c0_13 = arith.constant 0 : index
      %28 = vector.load %arg5[%c0_12, %c0_13] : memref<16x128xf32, #tpu.memory_space<vmem>>, vector<16x128xf32>
      %29 = vector.shape_cast %27 : vector<16x128xf32> to vector<1x16x128xf32>
      %cst_14 = arith.constant dense<0.000000e+00> : vector<16x128xf32>
      %30 = vector.multi_reduction <add>, %29, %cst_14 [0] : vector<1x16x128xf32> to vector<16x128xf32>
      %31 = arith.addf %28, %30 : vector<16x128xf32>
      %c0_15 = arith.constant 0 : index
      %c0_16 = arith.constant 0 : index
      %32 = vector.load %arg5[%c0_15, %c0_16] : memref<16x128xf32, #tpu.memory_space<vmem>>, vector<16x128xf32>
      tpu.vector_store %arg5[%c0_15, %c0_16], %31 {strides = array<i32>} : memref<16x128xf32, #tpu.memory_space<vmem>>, vector<16x128xf32>,
    } else {
    }
    %c16_i32_4 = arith.constant 16 : i32
    %10 = arith.addi %5, %c16_i32_4 : i32
    %c16_i32_5 = arith.constant 16 : i32
    %11 = arith.cmpi sgt, %10, %c16_i32_5 : i32
    %12 = arith.extui %11 : i1 to i32
    %c0_i32_6 = arith.constant 0 : i32
    %13 = arith.cmpi ne, %12, %c0_i32_6 : i32
    scf.if %13 {
      %17 = tpu.iota {dimensions = array<i32: 0>} : vector<16x128xi32>
      %18 = vector.broadcast %5 : i32 to vector<16x128xi32>
      %19 = arith.addi %18, %17 : vector<16x128xi32>
      %c16_i32_9 = arith.constant 16 : i32
      %20 = vector.broadcast %c16_i32_9 : i32 to vector<16x128xi32>
      %21 = arith.cmpi slt, %19, %20 : vector<16x128xi32>
      %c0 = arith.constant 0 : index
      %c0_10 = arith.constant 0 : index
      %22 = vector.load %arg2[%c0, %c0_10] : memref<16x128xf32, #tpu.memory_space<vmem>>, vector<16x128xf32>
      %c0_11 = arith.constant 0 : index
      %c0_12 = arith.constant 0 : index
      %23 = vector.load %arg3[%c0_11, %c0_12] : memref<16x128xf32, #tpu.memory_space<vmem>>, vector<16x128xf32>
      %24 = arith.subf %22, %23 : vector<16x128xf32>
      %25 = math.absf %24 : vector<16x128xf32>
      %26 = math.absf %22 : vector<16x128xf32>
      %cst = arith.constant 0.00999999977 : f32
      %27 = vector.broadcast %cst : f32 to vector<16x128xf32>
      %28 = arith.addf %27, %26 : vector<16x128xf32>
      %29 = math.absf %23 : vector<16x128xf32>
      %30 = arith.addf %28, %29 : vector<16x128xf32>
      %31 = tpu.reciprocal %30 {approx = true} : vector<16x128xf32> -> vector<16x128xf32>
      %32 = arith.mulf %25, %31 : vector<16x128xf32>
      %cst_13 = arith.constant 0.000000e+00 : f32
      %33 = vector.broadcast %cst_13 : f32 to vector<16x128xf32>
      %34 = arith.select %21, %32, %33 : vector<16x128xi1>, vector<16x128xf32>
      %c0_14 = arith.constant 0 : index
      %c0_15 = arith.constant 0 : index
      %35 = vector.load %arg5[%c0_14, %c0_15] : memref<16x128xf32, #tpu.memory_space<vmem>>, vector<16x128xf32>
      %36 = vector.shape_cast %34 : vector<16x128xf32> to vector<1x16x128xf32>
      %cst_16 = arith.constant dense<0.000000e+00> : vector<16x128xf32>
      %37 = vector.multi_reduction <add>, %36, %cst_16 [0] : vector<1x16x128xf32> to vector<16x128xf32>
      %38 = arith.addf %35, %37 : vector<16x128xf32>
      %c0_17 = arith.constant 0 : index
      %c0_18 = arith.constant 0 : index
      %39 = vector.load %arg5[%c0_17, %c0_18] : memref<16x128xf32, #tpu.memory_space<vmem>>, vector<16x128xf32>
      tpu.vector_store %arg5[%c0_17, %c0_18], %38 {strides = array<i32>} : memref<16x128xf32, #tpu.memory_space<vmem>>, vector<16x128xf32>,
    } else {
    }
    %c0_i32_7 = arith.constant 0 : i32
    %14 = arith.cmpi eq, %arg1, %c0_i32_7 : i32
    %15 = arith.extui %14 : i1 to i32
    %c0_i32_8 = arith.constant 0 : i32
    %16 = arith.cmpi ne, %15, %c0_i32_8 : i32
    scf.if %16 {
      %c0 = arith.constant 0 : index
      %c0_9 = arith.constant 0 : index
      %17 = vector.load %arg5[%c0, %c0_9] : memref<16x128xf32, #tpu.memory_space<vmem>>, vector<16x128xf32>
      %cst = arith.constant dense<0.000000e+00> : vector<128xf32>
      %18 = vector.multi_reduction <add>, %17, %cst [0] : vector<16x128xf32> to vector<128xf32>
      %19 = vector.shape_cast %18 : vector<128xf32> to vector<1x128xf32>
      %c0_10 = arith.constant 0 : index
      %c0_11 = arith.constant 0 : index
      %20 = vector.load %arg4[%c0_10, %c0_11] : memref<1x128xf32, #tpu.memory_space<vmem>>, vector<1x128xf32>
      tpu.vector_store %arg4[%c0_10, %c0_11], %19 {strides = array<i32>} : memref<1x128xf32, #tpu.memory_space<vmem>>, vector<1x128xf32>,
    } else {
    }
    return
  }
  func.func @transform_0(%arg0: i32, %arg1: i32) -> (i32, i32) {
    %c1_i32 = arith.constant 1 : i32
    %0 = arith.muli %arg0, %c1_i32 : i32
    %1 = arith.addi %0, %arg1 : i32
    %c0_i32 = arith.constant 0 : i32
    %2 = arith.minsi %1, %c0_i32 : i32
    %c0_i32_0 = arith.constant 0 : i32
    %c0_i32_1 = arith.constant 0 : i32
    return %2, %c0_i32_0 : i32, i32
  }
  func.func @transform_1(%arg0: i32, %arg1: i32) -> (i32, i32) {
    %c1_i32 = arith.constant 1 : i32
    %0 = arith.muli %arg0, %c1_i32 : i32
    %1 = arith.addi %0, %arg1 : i32
    %c0_i32 = arith.constant 0 : i32
    %2 = arith.minsi %1, %c0_i32 : i32
    %c0_i32_0 = arith.constant 0 : i32
    %c0_i32_1 = arith.constant 0 : i32
    return %2, %c0_i32_0 : i32, i32
  }
  func.func @transform_2(%arg0: i32, %arg1: i32) -> (i32, i32) {
    %c0_i32 = arith.constant 0 : i32
    %c0_i32_0 = arith.constant 0 : i32
    return %arg0, %c0_i32 : i32, i32
  }
}

</mosaic_0001>

<bundles_post_ra>
// kernel: tpu_custom_call.1
= control target key start
LH: loop header
LB: loop body
LE: loop exit
PB: predicated region body
PF: predicated region fallthrough
CT: control target
= control target key end

     0   :  { %7 = vsyncpa [#allocation4], 0  ;;  %s280_s0 = inlined_call_operand.hbm [shape: f32[16,128], index: 0, kind: input, shape index: {}]   ;;  %s281_s1 = inlined_call_operand.hbm [shape: f32[16,128], index: 1, kind: input, shape index: {}]   ;;  %s282_s2 = inlined_call_operand.hbm [shape: f32[1,128], index: 2, kind: output, shape index: {}]  }
   0x1   :  { %8 = vsyncpa [#allocation7], 0 }
   0x2   :  { %9 = vsyncpa [#allocation5], 0  ;;  %s251_s9 = smov [#allocation3]  }
   0x3   :  { %s21_s10 = sshll.u32 %s251_s9, 4  ;;  %s22_s10 = int_to_ptr.vmem [resolvable:$true] %s21_s10 }
   0x4   :  { %s193_s11 = scalar_lea.vmem %s22_s10, 256  ;;  %p198_p1 = scmp.lt.s32.totalorder %s22_s10, %s22_s10 }
   0x5   :  { %p194_p0 = scmp.ne.s32.totalorder %s22_s10, %s193_s11  ;;  %p199_p2 = scmp.lt.s32.totalorder %s193_s11, %s193_s11 }
   0x7   :  { %p200_p3 = por %p199_p2, %p198_p1 }
   0x9   :  { %p201_p4 = pnand %p200_p3, %p194_p0 }
   0xb   :  { %204 = shalt.err (!%p201_p4)
}
   0xc   :  { %s252_s12 = smov 128   ;;  %s253_s13 = smov 8  }
   0xd   :  { %27 = dma.hbm_to_vmem [thread:$0]  %s280_s0, 256, %s22_s10, [#allocation4], %s252_s12, %s252_s12, %s253_s13  }
   0xe   :  { %s254_s16 = smov [#allocation6]  }
   0xf   :  { %s39_s17 = sshll.u32 %s254_s16, 4  ;;  %s40_s17 = int_to_ptr.vmem [resolvable:$true] %s39_s17 }
  0x10   :  { %s213_s18 = scalar_lea.vmem %s40_s17, 256  ;;  %p218_p6 = scmp.lt.s32.totalorder %s40_s17, %s40_s17 }
  0x11   :  { %p214_p5 = scmp.ne.s32.totalorder %s40_s17, %s213_s18  ;;  %p219_p7 = scmp.lt.s32.totalorder %s213_s18, %s213_s18 }
  0x13   :  { %p220_p8 = por %p219_p7, %p218_p6 }
  0x15   :  { %p221_p9 = pnand %p220_p8, %p214_p5 }
  0x17   :  { %224 = shalt.err (!%p221_p9)
}
  0x18   :  { %45 = dma.hbm_to_vmem [thread:$0]  %s281_s1, 256, %s40_s17, [#allocation7], %s252_s12, %s252_s12, %s253_s13  }
  0x19   :  { %245 = dma.done.wait [#allocation4], 256  }
  0x1a   :  { %246 = vsyncadd [#allocation4], 4294967040 }
  0x1b   :  { %247 = dma.done.wait [#allocation7], 256  }
  0x1c   :  { %248 = vsyncadd [#allocation7], 4294967040  ;;  %v73_v0 = vld [vmem:[#allocation3] sm:$0xff]  ;;  %v74_v1 = vld [vmem:[#allocation3 + $0x8] sm:$0xff]  ;;  %s255_s0 = smov [#allocation8]  }
  0x1d   :  { %v75_v2 = vld [vmem:[#allocation6] sm:$0xff]  ;;  %v76_v3 = vld [vmem:[#allocation6 + $0x8] sm:$0xff]  ;;  %v81_v4 = vand.u32 2147483647, %v73_v0  ;;  %v82_v5 = vand.u32 2147483647, %v74_v1 }
  0x1e   :  { %v85_v6 = vand.u32 2147483647, %v75_v2  ;;  %v86_v7 = vand.u32 2147483647, %v76_v3  ;;  %v77_v12 = vsub.f32 %v73_v0, %v75_v2  ;;  %v78_v13 = vsub.f32 %v74_v1, %v76_v3  ;;  %s162_s1 = sshll.u32 %s255_s0, 4  ;;  %s163_s1 = int_to_ptr.vmem [resolvable:$true] %s162_s1 }
  0x1f   :  { %v83_v8 = vadd.f32 0.01, %v81_v4  ;;  %v84_v9 = vadd.f32 0.01, %v82_v5  ;;  %s225_s21 = scalar_lea.vmem %s163_s1, 16  ;;  %s229_s22 = scalar_lea.vmem %s163_s1, 32 }
  0x20   :  { %v79_v14 = vand.u32 2147483647, %v77_v12  ;;  %v80_v15 = vand.u32 2147483647, %v78_v13  ;;  %p226_p10 = scmp.ne.s32.totalorder %s163_s1, %s225_s21  ;;  %p230_p11 = scmp.lt.s32.totalorder %s163_s1, %s163_s1 }
  0x21   :  { %v87_v10 = vadd.f32 %v85_v6, %v83_v8  ;;  %v88_v11 = vadd.f32 %v86_v7, %v84_v9  ;;  %p231_p12 = scmp.lt.s32.totalorder %s229_s22, %s225_s21 }
  0x23   :  { %181 = vrcp.f32 %v87_v10  ;;  %p232_p13 = por %p231_p12, %p230_p11 }
  0x24   :  { %183 = vrcp.f32 %v88_v11 }
  0x25   :  { %p233_p0 = pnand %p232_p13, %p226_p10 }
  0x30   :  { %v182_v16 = vpop.eup %181 }
  0x31   :  { %v184_v17 = vpop.eup %183  ;;  %v91_v18 = vmul.f32 %v182_v16, %v79_v14 }
  0x32   :  { %v92_v19 = vmul.f32 %v184_v17, %v80_v15 }
  0x34   :  { %v148_v20 = vadd.f32 %v92_v19, %v91_v18 }
  0x36   :  { %v149_v21 = vrot.slane %v148_v20, 4 }
  0x38   :  { %v150_v22 = vadd.f32 %v149_v21, %v148_v20 }
  0x3a   :  { %v151_v23 = vrot.slane %v150_v22, 2 }
  0x3c   :  { %v152_v24 = vadd.f32 %v151_v23, %v150_v22 }
  0x3e   :  { %v153_v25 = vrot.slane %v152_v24, 1 }
  0x40   :  { %v154_v26 = vadd.f32 %v153_v25, %v152_v24 }
  0x42   :  { %155 = vst [vmem:[#allocation8] sm:$0x1] %v154_v26 }
  0x43   :  { %236 = shalt.err (!%p233_p0)
}
  0x44   :  { %165 = dma.vmem_to_hbm [thread:$0]  %s163_s1, 16, %s282_s2, [#allocation5]  }
  0x45   :  { %249 = dma.done.wait [#allocation5], 16  }
  0x46   :  { %250 = vsyncadd [#allocation5], 4294967280 }
  0x47   :  { %169 = vsyncpa [#allocation4], 1 }
  0x48   :  { %170 = vsyncpa [#allocation7], 1 }
  0x49   :  { %171 = vsyncpa [#allocation5], 1 }

</bundles_post_ra>
